<compile_context>
chip_gen: v7x
topology: tpu7x:2x2x1
jax: 0.10.0
libtpu: 0.0.40
codegen_flags: <defaults>
</compile_context>

<pallas_src>
import functools

import jax
import jax.numpy as jnp
from jax.experimental import pallas as pl
from jax.experimental.pallas import tpu as pltpu

LANES = 128  # pad the feature axis to full lane width


def graphnn_kernel(m_ref, p_ref, out_ref):
    n = out_ref.shape[0]          # number of nodes (static)
    lanes = out_ref.shape[1]      # 128

    # Packed bf16 buffer:
    #   rows [0, n)        : [ A (n cols) | X (d cols) | zeros ]
    #   rows [n, n + 128)  : w12v, i.e. W1@W2 placed at rows [n, n+d) / cols [0, d),
    #                        zeros elsewhere, so that ax @ w12v == X @ (W1 @ W2).
    ax = m_ref[0:n, :]                       # (n, 128) bf16
    a = m_ref[0:n, 0:n]                      # (n, n)   bf16 normalized adjacency
    w12v = m_ref[n:n + lanes, :]             # (128, 128) bf16

    c = p_ref[0:1, :]                        # (1, 128) f32  b1 @ W2 (zero-padded)
    gamma = p_ref[1:2, :]                    # (1, 128) f32
    beta = p_ref[2:3, :]                     # (1, 128) f32

    # Fused GCN layers (dropout == identity):  X @ (W1 W2)
    xw = jnp.dot(ax, w12v, preferred_element_type=jnp.float32)               # (n, 128)
    # inner = A X W12 + 1 * (b1 W2)   (b1 pushed through W2)
    inner = jnp.dot(a, xw.astype(jnp.bfloat16),
                    preferred_element_type=jnp.float32) + c                  # (n, 128)
    # H2 = A @ inner   (gnn2 bias b2 dropped: cancelled by BN mean subtraction)
    h2 = jnp.dot(a, inner.astype(jnp.bfloat16),
                 preferred_element_type=jnp.float32)                         # (n, 128)

    # BatchNorm1d over the node axis (training-mode batch stats, biased variance).
    # Reductions done on the MXU (ones-row matmuls) instead of axis-0 XLU reductions.
    ones_row = jnp.full((1, n), 1.0 / n, dtype=jnp.float32)
    mean = jnp.dot(ones_row, h2, preferred_element_type=jnp.float32)         # (1, 128)
    cen = h2 - mean
    var = jnp.dot(ones_row, cen * cen, preferred_element_type=jnp.float32)   # (1, 128)

    # Padded columns are exactly zero all the way through, so the padded output
    # columns come out as 0 * rsqrt(eps) * gamma + 0 == 0.
    out_ref[...] = cen * jax.lax.rsqrt(var + 1e-5) * gamma + beta


def build_norm_adjacency(edge_index, num_nodes):
    """Dense D^-1/2 (A + I) D^-1/2, matching torch_geometric GCNConv defaults."""
    src, dst = edge_index[0], edge_index[1]
    loop = jnp.arange(num_nodes, dtype=edge_index.dtype)
    src = jnp.concatenate([src, loop])
    dst = jnp.concatenate([dst, loop])
    w = jnp.ones_like(src, dtype=jnp.float32)
    deg = jnp.zeros((num_nodes,), jnp.float32).at[dst].add(w)
    deg_inv_sqrt = jnp.where(deg > 0, jax.lax.rsqrt(deg), 0.0)
    norm = deg_inv_sqrt[src] * deg_inv_sqrt[dst]
    # out[i] = sum over edges (j -> i) of norm * x[j]  =>  A[dst, src] = norm
    return jnp.zeros((num_nodes, num_nodes), jnp.float32).at[dst, src].add(norm)


def prepare_graphnn_inputs(edge_index, params, num_nodes):
    """One-time packing.  Call once, reuse the returned buffers for every forward."""
    x, w1, b1, w2, b2, gamma, beta = params
    n, d = x.shape
    del b2  # cancelled exactly by training-mode BatchNorm mean subtraction
    assert d <= LANES and n <= LANES and n + d <= LANES, (
        "demo-scale packing only")  # TODO(synk): row-tiled sparse path for big graphs

    a = build_norm_adjacency(edge_index, n)          # (n, n) f32
    w12 = w1 @ w2                                    # fused gnn1/gnn2 weight  (d, d)
    c = (b1 @ w2).reshape(d)                         # b1 pushed through W2    (d,)

    # bf16 mega-buffer (single DMA).  Layout documented in graphnn_kernel.
    top = jnp.zeros((n, LANES), jnp.float32)
    top = top.at[:, 0:n].set(a).at[:, n:n + d].set(x)
    w12v = jnp.zeros((LANES, LANES), jnp.float32).at[n:n + d, 0:d].set(w12)
    m = jnp.concatenate([top, w12v], axis=0).astype(jnp.bfloat16)   # (n+128, 128)

    # f32 small-parameter buffer (single DMA): rows = [b1@W2 | gamma | beta].
    p = jnp.zeros((3, LANES), jnp.float32)
    p = p.at[0, 0:d].set(c)
    p = p.at[1, 0:d].set(gamma.reshape(d))
    p = p.at[2, 0:d].set(beta.reshape(d))
    return m, p


def _graphnn_pallas_call(m, p, n):
    lanes = p.shape[1]
    flops = 2 * n * lanes * lanes + 4 * n * n * lanes + 4 * n * lanes
    bytes_accessed = m.size * 2 + p.size * 4 + n * lanes * 4
    vmem = pl.BlockSpec(memory_space=pltpu.MemorySpace.VMEM)
    return pl.pallas_call(
        graphnn_kernel,
        out_shape=jax.ShapeDtypeStruct((n, lanes), jnp.float32),
        in_specs=[vmem, vmem],
        out_specs=vmem,
        cost_estimate=pl.CostEstimate(flops=flops, transcendentals=lanes,
                                      bytes_accessed=bytes_accessed),
        compiler_params=pltpu.CompilerParams(vmem_limit_bytes=32 * 1024 * 1024),
    )(m, p)


@functools.partial(jax.jit, static_argnames=("n", "d"))
def graphnn_apply(m, p, *, n, d):
    """Steady-state forward on pre-packed buffers (no per-call adjacency rebuild)."""
    out_padded = _graphnn_pallas_call(m, p, n)   # (n, 128), lane-dense store
    return out_padded[:, :d]                     # drop feature padding


def graphnn_forward(edge_index, params, num_nodes):
    """Convenience end-to-end path (prepare + apply)."""
    n, d = params[0].shape
    m, p = prepare_graphnn_inputs(edge_index, params, num_nodes)
    return graphnn_apply(m, p, n=n, d=d)


def init_params(key, ntoken, ninp):
    k_emb, k_w1, k_w2 = jax.random.split(key, 3)

    def xavier_normal(k, shape):
        fan_in, fan_out = shape
        std = (2.0 / (fan_in + fan_out)) ** 0.5
        return std * jax.random.normal(k, shape, jnp.float32)

    def glorot_uniform(k, shape):
        fan_in, fan_out = shape
        limit = (6.0 / (fan_in + fan_out)) ** 0.5
        return jax.random.uniform(k, shape, jnp.float32, -limit, limit)

    x = xavier_normal(k_emb, (ntoken, ninp))            # embedding.weight
    w1 = glorot_uniform(k_w1, (ninp, 2 * ninp))         # gnn1 weight
    b1 = jnp.zeros((1, 2 * ninp), jnp.float32)          # gnn1 bias
    w2 = glorot_uniform(k_w2, (2 * ninp, ninp))         # gnn2 weight
    b2 = jnp.zeros((1, ninp), jnp.float32)              # gnn2 bias (BN cancels it)
    gamma = jnp.ones((1, ninp), jnp.float32)            # batch_norm weight
    beta = jnp.zeros((1, ninp), jnp.float32)            # batch_norm bias
    return x, w1, b1, w2, b2, gamma, beta


if __name__ == "__main__":
    NTOKEN = 64   # number of nodes / vocabulary size
    NINP = 32     # embedding dim

    key = jax.random.PRNGKey(0)
    params = init_params(key, NTOKEN, NINP)

    # Deterministic small graph: a ring plus a few chords (undirected).
    src = jnp.arange(NTOKEN, dtype=jnp.int32)
    dst = (src + 1) % NTOKEN
    chord_src = jnp.arange(0, NTOKEN, 4, dtype=jnp.int32)
    chord_dst = (chord_src + 7) % NTOKEN
    edge_src = jnp.concatenate([src, dst, chord_src, chord_dst])
    edge_dst = jnp.concatenate([dst, src, chord_dst, chord_src])
    edge_index = jnp.stack([edge_src, edge_dst], axis=0)   # (2, E)

    # One-time preparation (hoisted off the per-forward critical path).
    m, p = jax.jit(prepare_graphnn_inputs, static_argnums=2)(edge_index, params, NTOKEN)
    jax.block_until_ready((m, p))

    # Steady-state forwards reuse the cached packed buffers.
    out = graphnn_apply(m, p, n=NTOKEN, d=NINP)
    out = graphnn_apply(m, p, n=NTOKEN, d=NINP)
    jax.block_until_ready(out)

    assert out.shape == (NTOKEN, NINP) and out.dtype == jnp.float32
    print("KERNEL_OK")
</pallas_src>

<mosaic_0001>
module attributes {stable_mosaic.version = 11 : i64} {
  func.func private @main(%arg0: i32) attributes {dimension_semantics = [#tpu.dimension_semantics<core_parallel>], iteration_bounds = array<i64: 2>, tpu.core_type = #tpu.core_type<sc_scalar_subcore>, window_params = []} {
    return
  }
}

module attributes {stable_mosaic.version = 11 : i64} {
  func.func private @main(%arg0: i32) attributes {dimension_semantics = [#tpu.dimension_semantics<core_parallel>], iteration_bounds = array<i64: 2>, tpu.core_type = #tpu.core_type<sc_scalar_subcore>, window_params = []} {
    return
  }
}

</mosaic_0001>

<bundles_post_ra>
// kernel: mul.1
= control target key start
LH: loop header
LB: loop body
LE: loop exit
PB: predicated region body
PF: predicated region fallthrough
CT: control target
= control target key end

     0   :  { %s34_s0 = inlined_call_operand.vmem [shape: f32[224], index: 0, kind: input, shape index: {}]   ;;  %s35_s1 = inlined_call_operand.vmem [shape: f32[224], index: 1, kind: input, shape index: {}]   ;;  %s36_s2 = inlined_call_operand.vmem [shape: f32[224], index: 2, kind: output, shape index: {}]  }
   0x1   :  { %v3_v0 = vld [vmem:[%s34_s0] sm:$0x3] }
   0x2   :  { %v4_v1 = vld [vmem:[%s35_s1] sm:$0x3] }
   0x3   :  { %v7_v2 = vmul.f32 %v4_v1, %v3_v0 }
   0x5   :  { %9 = vst [vmem:[%s36_s2] sm:$0x3] %v7_v2 }

</bundles_post_ra>
